<compile_context>
chip_gen: v7x
topology: tpu7x:2x2x1
jax: 0.10.0
libtpu: 0.0.40
codegen_flags: <defaults>
</compile_context>

<pallas_src>
import functools
import math

import jax
import jax.numpy as jnp
from jax.experimental import pallas as pl
from jax.experimental.pallas import tpu as pltpu


# --------------------------------------------------------------------------
# In-kernel helpers
# --------------------------------------------------------------------------
def _softmax_rows(scores):
    """Stable softmax along the last (lane) axis, f32.

    Normalization uses the EUP approximate reciprocal refined with one
    Newton-Raphson step: ~f32-exact while keeping the divide off the VPU.
    """
    s = scores - jnp.max(scores, axis=-1, keepdims=True)
    e = jnp.exp(s)
    denom = jnp.sum(e, axis=-1, keepdims=True)
    inv = pl.reciprocal(denom, approx=True)
    inv = inv * (2.0 - denom * inv)
    return e * inv


def _gep_pool_kernel(v_ref, a_ref, w_ref, b_ref, m_ref, out_v_ref, out_a_ref,
                     ft_ref, *, use_mask, use_bias):
    """n_filters > 1 path.  Grid = (batch tiles, A column blocks).

    v_ref:     (TB, N, F)        node features (f32 or bf16), resident over c
    a_ref:     (TB, N, Lc*N)     adjacency column block (whole edge types)
    w_ref:     (G, F)            nn.Linear weight, already in V.dtype
    b_ref:     (1, G, 1)         bias (f32)
    m_ref:     (TB, G, N)        optional mask, pre-transposed (f32)
    out_v_ref: (TB, G, F)        resident over c, written at c == 0
    out_a_ref: (1, TB, G, Lc*G)  per-column-block pooled adjacency
    ft_ref:    (TB, G, N) f32    VMEM scratch: softmax factors (transposed)
    """
    c = pl.program_id(1)
    TB, N, _ = v_ref.shape
    G = w_ref.shape[0]
    Lc = a_ref.shape[2] // N

    # Factors / softmax / node pooling: once per batch tile (column step 0).
    @pl.when(c == 0)
    def _compute_factors():
        v = v_ref[...]                                        # (TB, N, F)
        w = jnp.broadcast_to(w_ref[...], (TB, G, F := v.shape[-1]))
        # scores^T: nodes on the lane axis -> lane-dense softmax reductions.
        s = jnp.einsum('tgf,tnf->tgn', w, v,
                       preferred_element_type=jnp.float32)    # (TB, G, N) f32
        if use_bias:
            s = s + b_ref[...]
        if use_mask:
            s = s * m_ref[...]
        ft = _softmax_rows(s)                                 # (TB, G, N) f32
        ft_ref[...] = ft
        # result = factors^T @ V  -> (TB, G, F)
        out_v_ref[...] = jnp.einsum(
            'tgn,tnf->tgf', ft.astype(v.dtype), v,
            preferred_element_type=jnp.float32).astype(out_v_ref.dtype)

    ft = ft_ref[...]                                          # (TB, G, N) f32
    a = a_ref[...]                                            # (TB, N, Lc*N)

    # Dominant, HBM-bound contraction: one MXU pass over the A column block.
    #   af[t, g, l*N + j] = sum_i factors[t, i, g] * A[t, i, l, j]
    af = jnp.einsum('tgn,tnm->tgm', ft.astype(a.dtype), a,
                    preferred_element_type=jnp.float32)       # (TB, G, Lc*N)

    # Tiny epilogue: per edge type, (G, N) x (N, G) -> (G, G); blocks are
    # assembled and stored with ONE store per grid step (no narrow masked
    # stores).  When column splitting is active N % 128 == 0, so the l*N lane
    # slices below are 128-aligned.
    blocks = []
    for l in range(Lc):
        af_l = af[:, :, l * N:(l + 1) * N]                    # (TB, G, N)
        blocks.append(jnp.einsum('tgn,thn->tgh', af_l, ft,
                                 preferred_element_type=jnp.float32))
    blk = blocks[0] if Lc == 1 else jnp.concatenate(blocks, axis=-1)
    out_a_ref[0] = blk.astype(out_a_ref.dtype)                # (TB, G, Lc*G)


def _gep_single_kernel(v_ref, w_ref, b_ref, m_ref, out_v_ref,
                       *, use_mask, use_bias):
    """n_filters == 1 path: node pooling only; A passes through outside."""
    TB, N, F = v_ref.shape
    G = w_ref.shape[0]
    v = v_ref[...]
    w = jnp.broadcast_to(w_ref[...], (TB, G, F))
    s = jnp.einsum('tgf,tnf->tgn', w, v,
                   preferred_element_type=jnp.float32)        # (TB, 1, N)
    if use_bias:
        s = s + b_ref[...]
    if use_mask:
        s = s * m_ref[...]
    ft = _softmax_rows(s)
    out_v_ref[...] = jnp.einsum(
        'tgn,tnf->tgf', ft.astype(v.dtype), v,
        preferred_element_type=jnp.float32).astype(out_v_ref.dtype)


# --------------------------------------------------------------------------
# Tiling / VMEM accounting
# --------------------------------------------------------------------------
def _round_up(x, m):
    return ((x + m - 1) // m) * m


def _padded_bytes(shape, dtype):
    """Bytes of a VMEM block after (sublane, lane) tile padding."""
    it = jnp.dtype(dtype).itemsize
    dims = list(shape)
    dims[-1] = _round_up(dims[-1], 128)
    if len(dims) >= 2:
        dims[-2] = _round_up(dims[-2], 8 * max(1, 4 // it))   # 8 f32 / 16 bf16
    n = 1
    for d in dims:
        n *= d
    return n * it


def _vmem_capacity():
    try:
        return int(pltpu.get_tpu_info().vmem_capacity_bytes)
    except Exception:
        return 64 * 1024 * 1024          # conservative (v7x-sized) default


def _step_bytes(tb, lc, N, F, G, v_dt, a_dt, use_mask, a_bufs=2):
    """Padded VMEM working set of one grid step (explicit buffering factors)."""
    tot = a_bufs * _padded_bytes((tb, N, lc * N), a_dt)           # A blocks
    tot += 2 * _padded_bytes((tb, N, F), v_dt)                    # V blocks
    tot += 2 * _padded_bytes((tb, G, F), v_dt)                    # out_v blocks
    tot += 2 * _padded_bytes((1, tb, G, lc * G), a_dt)            # out_a blocks
    if use_mask:
        tot += 2 * _padded_bytes((tb, G, N), jnp.float32)         # mask blocks
    tot += 2 * (_padded_bytes((G, F), v_dt)
                + _padded_bytes((1, G, 1), jnp.float32))          # W, bias
    tot += _padded_bytes((tb, G, N), jnp.float32)                 # ft scratch
    tot += _padded_bytes((tb, G, lc * N), jnp.float32)            # af (f32)
    tot += 3 * _padded_bytes((tb, G, N), jnp.float32)             # softmax temps
    tot += _padded_bytes((tb, G, lc * G), jnp.float32)            # epilogue blk
    return tot


def _choose_tiling(B, N, F, G, L, v_dt, a_dt, use_mask, budget, max_tile=8):
    """Pick (tb, Lc): batch-tile size and edge types per A column block."""
    def divisors(n):
        return [d for d in range(1, n + 1) if n % d == 0]

    # Column splitting keeps whole l-slabs and is only legal when the A block
    # lane width Lc*N stays 128-aligned for Lc < L, i.e. N % 128 == 0.
    if N % 128 == 0 and L > 1:
        lc_all = sorted(divisors(L), reverse=True)
        lc_start = next((d for d in lc_all if d * N <= 2048), 1)  # ~512-2048 lanes
        lc_cands = [d for d in lc_all if d <= lc_start]           # descending
    else:
        lc_cands = [L]

    tb_all = [d for d in divisors(B) if d <= max_tile]
    if B >= 2:                       # keep >= 2 "parallel" batch steps (megacore)
        tb_all = [d for d in tb_all if B // d >= 2] or [1]

    for lc in lc_cands:
        # Don't batch-tile steps whose A slab is already big: enough per-step
        # work to hide the ~0.35us step cost, and keeps the f32 `af` small.
        a_blk = _padded_bytes((1, N, lc * N), a_dt)
        tb_cap = max(1, min(max_tile, (2 << 20) // max(a_blk, 1)))
        for tb in sorted([t for t in tb_all if t <= tb_cap], reverse=True) or [1]:
            if _step_bytes(tb, lc, N, F, G, v_dt, a_dt, use_mask) <= budget:
                return tb, lc
    return 1, lc_cands[-1]


def _pick_single_tile(B, N, F, G, v_dt, use_mask, budget, max_tile=8):
    def divisors(n):
        return [d for d in range(1, n + 1) if n % d == 0]
    cands = [d for d in divisors(B) if d <= max_tile]
    if B >= 2:
        cands = [d for d in cands if B // d >= 2] or [1]
    best = 1
    for t in sorted(cands):
        tot = (2 * _padded_bytes((t, N, F), v_dt)
               + 2 * _padded_bytes((t, G, F), v_dt)
               + 3 * _padded_bytes((t, G, N), jnp.float32))
        if use_mask:
            tot += 2 * _padded_bytes((t, G, N), jnp.float32)
        if tot <= budget:
            best = t
    return best


# --------------------------------------------------------------------------
# Public wrapper
# --------------------------------------------------------------------------
def graph_embed_pooling(V, A, weight, bias=None, mask=None):
    """Forward of GraphEmbedPoolingLayer.

    V: (B, N, F) node features (f32 or bf16 -- bf16 recommended on v5e);
    A: (B, N, L, N) adjacency; weight: (n_filters, F); bias: (n_filters,) or
    None; mask: broadcastable to (B, N, n_filters) or None.
    Returns (result.reshape(B, F), A) when n_filters == 1, otherwise
    (result (B, n_filters, F), pooled_A (B, n_filters, L, n_filters)).
    """
    V = jnp.asarray(V)
    A = jnp.asarray(A)
    if not jnp.issubdtype(V.dtype, jnp.floating):
        V = V.astype(jnp.float32)
    if not jnp.issubdtype(A.dtype, jnp.floating):
        A = A.astype(jnp.float32)

    B, N, F = V.shape
    G = int(weight.shape[0])
    W = jnp.asarray(weight).astype(V.dtype)        # hoisted cast (no per-step VPU cast)
    use_bias = bias is not None
    b3 = (jnp.asarray(bias, jnp.float32).reshape(1, G, 1) if use_bias
          else jnp.zeros((1, G, 1), jnp.float32))
    use_mask = mask is not None
    if use_mask:
        mk = jnp.broadcast_to(jnp.asarray(mask, jnp.float32), (B, N, G))
        mk = jnp.transpose(mk, (0, 2, 1))          # (B, G, N): lane-dense in kernel
    else:
        mk = jnp.ones((1, 1, 1), jnp.float32)

    cap = _vmem_capacity()
    budget = max(16 << 20, int(cap * 0.70))        # block-selection budget
    vmem_limit = max(32 << 20, min(int(cap * 0.90), cap - (4 << 20)))

    # ---------------- n_filters == 1: node pooling only --------------------
    if G == 1:
        tb = _pick_single_tile(B, N, F, G, V.dtype, use_mask, budget)
        mask_spec = (pl.BlockSpec((tb, 1, N), lambda b: (b, 0, 0)) if use_mask
                     else pl.BlockSpec((1, 1, 1), lambda b: (0, 0, 0)))
        out = pl.pallas_call(
            functools.partial(_gep_single_kernel,
                              use_mask=use_mask, use_bias=use_bias),
            out_shape=jax.ShapeDtypeStruct((B, 1, F), V.dtype),
            grid=(B // tb,),
            in_specs=[pl.BlockSpec((tb, N, F), lambda b: (b, 0, 0)),
                      pl.BlockSpec((1, F), lambda b: (0, 0)),
                      pl.BlockSpec((1, 1, 1), lambda b: (0, 0, 0)),
                      mask_spec],
            out_specs=pl.BlockSpec((tb, 1, F), lambda b: (b, 0, 0)),
            compiler_params=pltpu.CompilerParams(
                dimension_semantics=("parallel",),
                vmem_limit_bytes=vmem_limit),
        )(V, W, b3, mk)
        return out.reshape(B, F), A

    # ---------------- n_filters > 1: node pooling + pooled adjacency -------
    L = A.shape[2]
    tb, Lc = _choose_tiling(B, N, F, G, L, V.dtype, A.dtype, use_mask, budget)
    C = L // Lc
    n_steps = (B // tb) * C

    # Deepen the A pipeline on 128 MiB parts (v5e/v6e) when there are enough
    # steps and it still fits the budget; keep the default 2 on v7x.
    a_bufs = 2
    if (cap >= (100 << 20) and n_steps >= 3 and hasattr(pl, "Buffered")
            and _step_bytes(tb, Lc, N, F, G, V.dtype, A.dtype, use_mask,
                            a_bufs=3) <= budget):
        a_bufs = 3
    a_spec = pl.BlockSpec((tb, N, Lc * N), lambda b, c: (b, 0, c))
    if a_bufs > 2:
        try:
            a_spec = pl.BlockSpec((tb, N, Lc * N), lambda b, c: (b, 0, c),
                                  pipeline_mode=pl.Buffered(a_bufs))
        except TypeError:      # BlockSpec without pipeline_mode support
            a_spec = pl.BlockSpec((tb, N, Lc * N), lambda b, c: (b, 0, c))

    mask_spec = (pl.BlockSpec((tb, G, N), lambda b, c: (b, 0, 0)) if use_mask
                 else pl.BlockSpec((1, 1, 1), lambda b, c: (0, 0, 0)))

    # Free reshape: merge A's contiguous trailing dims (no transpose / no
    # extra HBM traffic on the dominant tensor).
    A_wide = A.reshape(B, N, L * N)

    out_v, out_a = pl.pallas_call(
        functools.partial(_gep_pool_kernel,
                          use_mask=use_mask, use_bias=use_bias),
        out_shape=(jax.ShapeDtypeStruct((B, G, F), V.dtype),
                   jax.ShapeDtypeStruct((C, B, G, Lc * G), A.dtype)),
        grid=(B // tb, C),
        in_specs=[pl.BlockSpec((tb, N, F), lambda b, c: (b, 0, 0)),
                  a_spec,
                  pl.BlockSpec((G, F), lambda b, c: (0, 0)),
                  pl.BlockSpec((1, G, 1), lambda b, c: (0, 0, 0)),
                  mask_spec],
        out_specs=(pl.BlockSpec((tb, G, F), lambda b, c: (b, 0, 0)),
                   pl.BlockSpec((1, tb, G, Lc * G), lambda b, c: (c, b, 0, 0))),
        scratch_shapes=[pltpu.VMEM((tb, G, N), jnp.float32)],
        compiler_params=pltpu.CompilerParams(
            dimension_semantics=("parallel", "arbitrary"),
            vmem_limit_bytes=vmem_limit),
    )(V, A_wide, W, b3, mk)

    # Reassemble the column blocks (tiny tensor): (C,B,G,Lc*G) -> (B,G,L,G).
    out_a = out_a.reshape(C, B, G, Lc, G)
    out_a = jnp.transpose(out_a, (1, 2, 0, 3, 4)).reshape(B, G, L, G)
    return out_v, out_a


# --------------------------------------------------------------------------
# Pure-JAX reference + tests
# --------------------------------------------------------------------------
def _reference(V, A, weight, bias=None, mask=None):
    V = jnp.asarray(V, jnp.float32)
    A = jnp.asarray(A, jnp.float32)
    factors = jnp.einsum('bnf,gf->bng', V, jnp.asarray(weight, jnp.float32))
    if bias is not None:
        factors = factors + jnp.asarray(bias, jnp.float32)
    if mask is not None:
        factors = factors * jnp.asarray(mask, jnp.float32)
    factors = jax.nn.softmax(factors, axis=1)
    result = jnp.einsum('bng,bnf->bgf', factors, V)
    G = weight.shape[0]
    if G == 1:
        return result.reshape(-1, V.shape[-1]), A
    pooled = jnp.einsum('bif,bilj,bjg->bflg', factors, A, factors)
    return result, pooled


if __name__ == "__main__":
    key = jax.random.PRNGKey(0)
    B, N, F, L, G = 2, 16, 32, 3, 4
    keys = jax.random.split(key, 12)

    V = jax.random.normal(keys[0], (B, N, F), jnp.float32)
    A = jax.random.normal(keys[1], (B, N, L, N), jnp.float32)

    bound = 1.0 / math.sqrt(F)
    W = jax.random.uniform(keys[2], (G, F), jnp.float32, -bound, bound)
    b = jax.random.uniform(keys[3], (G,), jnp.float32, -bound, bound)

    # --- n_filters > 1, f32 ---
    res, res_A = graph_embed_pooling(V, A, W, b)
    jax.block_until_ready((res, res_A))
    ref_res, ref_A = _reference(V, A, W, b)
    assert res.shape == (B, G, F) and res_A.shape == (B, G, L, G)
    assert jnp.allclose(res, ref_res, atol=1e-3, rtol=1e-3)
    assert jnp.allclose(res_A, ref_A, atol=1e-3, rtol=1e-3)

    # --- n_filters > 1, with mask ---
    mask = jax.random.uniform(keys[4], (B, N, 1), jnp.float32, 0.5, 1.5)
    res_m, res_Am = graph_embed_pooling(V, A, W, b, mask=mask)
    jax.block_until_ready((res_m, res_Am))
    ref_m, ref_Am = _reference(V, A, W, b, mask=mask)
    assert jnp.allclose(res_m, ref_m, atol=1e-3, rtol=1e-3)
    assert jnp.allclose(res_Am, ref_Am, atol=1e-3, rtol=1e-3)

    # --- n_filters == 1 (A passes through unchanged) ---
    W1 = jax.random.uniform(keys[5], (1, F), jnp.float32, -bound, bound)
    b1 = jax.random.uniform(keys[6], (1,), jnp.float32, -bound, bound)
    res1, A_out = graph_embed_pooling(V, A, W1, b1)
    jax.block_until_ready((res1, A_out))
    ref1, _ = _reference(V, A, W1, b1)
    assert res1.shape == (B, F)
    assert jnp.allclose(res1, ref1, atol=1e-3, rtol=1e-3)
    assert jnp.array_equal(A_out, A)

    # --- bf16 inputs (halves HBM traffic on the memory-bound A tensor) ---
    V_bf = V.astype(jnp.bfloat16)
    A_bf = A.astype(jnp.bfloat16)
    res_b, res_Ab = graph_embed_pooling(V_bf, A_bf, W, b)
    jax.block_until_ready((res_b, res_Ab))
    ref_b, ref_Ab = _reference(V_bf.astype(jnp.float32),
                               A_bf.astype(jnp.float32), W, b)
    assert res_b.dtype == jnp.bfloat16 and res_Ab.dtype == jnp.bfloat16
    assert jnp.allclose(res_b.astype(jnp.float32), ref_b, atol=5e-2, rtol=5e-2)
    assert jnp.allclose(res_Ab.astype(jnp.float32), ref_Ab, atol=5e-2, rtol=5e-2)

    # --- larger graph exercising the column-split (multi-step) grid path ---
    B2, N2, F2, L2, G2 = 2, 256, 64, 16, 4
    V2 = jax.random.normal(keys[7], (B2, N2, F2), jnp.float32)
    A2 = jax.random.normal(keys[8], (B2, N2, L2, N2), jnp.float32)
    bound2 = 1.0 / math.sqrt(F2)
    W2 = jax.random.uniform(keys[9], (G2, F2), jnp.float32, -bound2, bound2)
    b2 = jax.random.uniform(keys[10], (G2,), jnp.float32, -bound2, bound2)
    res2, res_A2 = graph_embed_pooling(V2, A2, W2, b2)
    jax.block_until_ready((res2, res_A2))
    ref2, ref_A2 = _reference(V2, A2, W2, b2)
    assert res2.shape == (B2, G2, F2) and res_A2.shape == (B2, G2, L2, G2)
    assert jnp.allclose(res2, ref2, atol=1e-4, rtol=1e-2)
    assert jnp.allclose(res_A2, ref_A2, atol=1e-4, rtol=1e-2)

    print("KERNEL_OK")
</pallas_src>

<mosaic_0001>
module attributes {stable_mosaic.version = 11 : i64} {
  func.func @_gep_pool_kernel(%arg0: i32, %arg1: i32, %arg2: memref<1x16x32xf32, #tpu.memory_space<vmem>>, %arg3: memref<1x16x48xf32, #tpu.memory_space<vmem>>, %arg4: memref<4x32xf32, #tpu.memory_space<vmem>>, %arg5: memref<1x4x1xf32, #tpu.memory_space<vmem>>, %arg6: memref<1x1x1xf32, #tpu.memory_space<vmem>>, %arg7: memref<1x4x32xf32, #tpu.memory_space<vmem>>, %arg8: memref<1x1x4x12xf32, #tpu.memory_space<vmem>>, %arg9: memref<1x4x16xf32, #tpu.memory_space<vmem>>) attributes {dimension_semantics = [#tpu.dimension_semantics<parallel>, #tpu.dimension_semantics<arbitrary>], iteration_bounds = array<i64: 2, 1>, scalar_prefetch = 0 : i64, scratch_operands = 1 : i64, tpu.core_type = #tpu.core_type<tc>, window_params = [{transform_indices = @transform_0, window_bounds = array<i64: 1, 16, 32>}, {transform_indices = @transform_1, window_bounds = array<i64: 1, 16, 48>}, {pipeline_mode = #tpu.pipeline_mode<synchronous>, transform_indices = @transform_2, window_bounds = array<i64: 4, 32>}, {pipeline_mode = #tpu.pipeline_mode<synchronous>, transform_indices = @transform_3, window_bounds = array<i64: 1, 4, 1>}, {pipeline_mode = #tpu.pipeline_mode<synchronous>, transform_indices = @transform_4, window_bounds = array<i64: 1, 1, 1>}, {transform_indices = @transform_5, window_bounds = array<i64: 1, 4, 32>}, {transform_indices = @transform_6, window_bounds = array<i64: 1, 1, 4, 12>}]} {
    %c0_i32 = arith.constant 0 : i32
    %0 = arith.cmpi eq, %arg1, %c0_i32 : i32
    %1 = arith.extui %0 : i1 to i32
    %c0_i32_0 = arith.constant 0 : i32
    %2 = arith.cmpi ne, %1, %c0_i32_0 : i32
    scf.if %2 {
      %c0_13 = arith.constant 0 : index
      %c0_14 = arith.constant 0 : index
      %c0_15 = arith.constant 0 : index
      %16 = vector.load %arg2[%c0_13, %c0_14, %c0_15] : memref<1x16x32xf32, #tpu.memory_space<vmem>>, vector<1x16x32xf32>
      %c0_16 = arith.constant 0 : index
      %c0_17 = arith.constant 0 : index
      %17 = vector.load %arg4[%c0_16, %c0_17] : memref<4x32xf32, #tpu.memory_space<vmem>>, vector<4x32xf32>
      %18 = vector.shape_cast %17 : vector<4x32xf32> to vector<1x4x32xf32>
      "tpu.trace_start"() <{level = 10 : i32, message = "tgf,tnf->tgn"}> : () -> ()
      %cst_18 = arith.constant dense<0.000000e+00> : vector<1x4x16xf32>
      %19 = tpu.matmul %18, %16, %cst_18 {dimension_numbers = #tpu.dot_dimension_numbers<[2], [2], [1], [1], [0, 0, 0, 1, 1, 1], [0], [0]>} : vector<1x4x32xf32>, vector<1x16x32xf32>, vector<1x4x16xf32> -> vector<1x4x16xf32>
      "tpu.trace_stop"() : () -> ()
      %c0_19 = arith.constant 0 : index
      %c0_20 = arith.constant 0 : index
      %c0_21 = arith.constant 0 : index
      %20 = vector.load %arg5[%c0_19, %c0_20, %c0_21] : memref<1x4x1xf32, #tpu.memory_space<vmem>>, vector<1x4x1xf32>
      %21 = vector.broadcast %20 : vector<1x4x1xf32> to vector<1x4x16xf32>
      %22 = arith.addf %19, %21 : vector<1x4x16xf32>
      %cst_22 = arith.constant dense<0xFF800000> : vector<1x4xf32>
      %23 = vector.multi_reduction <maximumf>, %22, %cst_22 [2] : vector<1x4x16xf32> to vector<1x4xf32>
      %24 = vector.shape_cast %23 : vector<1x4xf32> to vector<1x4x1xf32>
      %25 = vector.broadcast %24 : vector<1x4x1xf32> to vector<1x4x16xf32>
      %26 = arith.subf %22, %25 : vector<1x4x16xf32>
      %27 = math.exp %26 : vector<1x4x16xf32>
      %cst_23 = arith.constant dense<0.000000e+00> : vector<1x4xf32>
      %28 = vector.multi_reduction <add>, %27, %cst_23 [2] : vector<1x4x16xf32> to vector<1x4xf32>
      %29 = vector.shape_cast %28 : vector<1x4xf32> to vector<1x4x1xf32>
      %30 = tpu.reciprocal %29 {approx = true} : vector<1x4x1xf32> -> vector<1x4x1xf32>
      %31 = arith.mulf %29, %30 : vector<1x4x1xf32>
      %cst_24 = arith.constant 2.000000e+00 : f32
      %32 = vector.broadcast %cst_24 : f32 to vector<1x4x1xf32>
      %33 = arith.subf %32, %31 : vector<1x4x1xf32>
      %34 = arith.mulf %30, %33 : vector<1x4x1xf32>
      %35 = vector.broadcast %34 : vector<1x4x1xf32> to vector<1x4x16xf32>
      %36 = arith.mulf %27, %35 : vector<1x4x16xf32>
      %c0_25 = arith.constant 0 : index
      %c0_26 = arith.constant 0 : index
      %c0_27 = arith.constant 0 : index
      %37 = vector.load %arg9[%c0_25, %c0_26, %c0_27] : memref<1x4x16xf32, #tpu.memory_space<vmem>>, vector<1x4x16xf32>
      tpu.vector_store %arg9[%c0_25, %c0_26, %c0_27], %36 {strides = array<i32>} : memref<1x4x16xf32, #tpu.memory_space<vmem>>, vector<1x4x16xf32>,
      "tpu.trace_start"() <{level = 10 : i32, message = "tgn,tnf->tgf"}> : () -> ()
      %cst_28 = arith.constant dense<0.000000e+00> : vector<1x4x32xf32>
      %38 = tpu.matmul %36, %16, %cst_28 {dimension_numbers = #tpu.dot_dimension_numbers<[2], [1], [1], [2], [0, 0, 0, 1, 1, 2], [0], [0]>} : vector<1x4x16xf32>, vector<1x16x32xf32>, vector<1x4x32xf32> -> vector<1x4x32xf32>
      "tpu.trace_stop"() : () -> ()
      %c0_29 = arith.constant 0 : index
      %c0_30 = arith.constant 0 : index
      %c0_31 = arith.constant 0 : index
      %39 = vector.load %arg7[%c0_29, %c0_30, %c0_31] : memref<1x4x32xf32, #tpu.memory_space<vmem>>, vector<1x4x32xf32>
      tpu.vector_store %arg7[%c0_29, %c0_30, %c0_31], %38 {strides = array<i32>} : memref<1x4x32xf32, #tpu.memory_space<vmem>>, vector<1x4x32xf32>,
    } else {
    }
    %c0 = arith.constant 0 : index
    %c0_1 = arith.constant 0 : index
    %c0_2 = arith.constant 0 : index
    %3 = vector.load %arg9[%c0, %c0_1, %c0_2] : memref<1x4x16xf32, #tpu.memory_space<vmem>>, vector<1x4x16xf32>
    %c0_3 = arith.constant 0 : index
    %c0_4 = arith.constant 0 : index
    %c0_5 = arith.constant 0 : index
    %4 = vector.load %arg3[%c0_3, %c0_4, %c0_5] : memref<1x16x48xf32, #tpu.memory_space<vmem>>, vector<1x16x48xf32>
    "tpu.trace_start"() <{level = 10 : i32, message = "tgn,tnm->tgm"}> : () -> ()
    %cst = arith.constant dense<0.000000e+00> : vector<1x4x48xf32>
    %5 = tpu.matmul %3, %4, %cst {dimension_numbers = #tpu.dot_dimension_numbers<[2], [1], [1], [2], [0, 0, 0, 1, 1, 2], [0], [0]>} : vector<1x4x16xf32>, vector<1x16x48xf32>, vector<1x4x48xf32> -> vector<1x4x48xf32>
    "tpu.trace_stop"() : () -> ()
    %6 = vector.extract_strided_slice %5 {offsets = [0, 0, 0], sizes = [1, 4, 16], strides = [1, 1, 1]} : vector<1x4x48xf32> to vector<1x4x16xf32>
    "tpu.trace_start"() <{level = 10 : i32, message = "tgn,thn->tgh"}> : () -> ()
    %cst_6 = arith.constant dense<0.000000e+00> : vector<1x4x4xf32>
    %7 = tpu.matmul %6, %3, %cst_6 {dimension_numbers = #tpu.dot_dimension_numbers<[2], [2], [1], [1], [0, 0, 0, 1, 1, 1], [0], [0]>} : vector<1x4x16xf32>, vector<1x4x16xf32>, vector<1x4x4xf32> -> vector<1x4x4xf32>
    "tpu.trace_stop"() : () -> ()
    %8 = vector.extract_strided_slice %5 {offsets = [0, 0, 16], sizes = [1, 4, 16], strides = [1, 1, 1]} : vector<1x4x48xf32> to vector<1x4x16xf32>
    "tpu.trace_start"() <{level = 10 : i32, message = "tgn,thn->tgh"}> : () -> ()
    %cst_7 = arith.constant dense<0.000000e+00> : vector<1x4x4xf32>
    %9 = tpu.matmul %8, %3, %cst_7 {dimension_numbers = #tpu.dot_dimension_numbers<[2], [2], [1], [1], [0, 0, 0, 1, 1, 1], [0], [0]>} : vector<1x4x16xf32>, vector<1x4x16xf32>, vector<1x4x4xf32> -> vector<1x4x4xf32>
    "tpu.trace_stop"() : () -> ()
    %10 = vector.extract_strided_slice %5 {offsets = [0, 0, 32], sizes = [1, 4, 16], strides = [1, 1, 1]} : vector<1x4x48xf32> to vector<1x4x16xf32>
    "tpu.trace_start"() <{level = 10 : i32, message = "tgn,thn->tgh"}> : () -> ()
    %cst_8 = arith.constant dense<0.000000e+00> : vector<1x4x4xf32>
    %11 = tpu.matmul %10, %3, %cst_8 {dimension_numbers = #tpu.dot_dimension_numbers<[2], [2], [1], [1], [0, 0, 0, 1, 1, 1], [0], [0]>} : vector<1x4x16xf32>, vector<1x4x16xf32>, vector<1x4x4xf32> -> vector<1x4x4xf32>
    "tpu.trace_stop"() : () -> ()
    %12 = tpu.concatenate %7, %9, %11 in 2 : vector<1x4x4xf32>, vector<1x4x4xf32>, vector<1x4x4xf32> -> vector<1x4x12xf32>
    %c0_9 = arith.constant 0 : index
    %c0_10 = arith.constant 0 : index
    %c0_11 = arith.constant 0 : index
    %c0_12 = arith.constant 0 : index
    %13 = vector.load %arg8[%c0_9, %c0_10, %c0_11, %c0_12] : memref<1x1x4x12xf32, #tpu.memory_space<vmem>>, vector<1x1x4x12xf32>
    %14 = vector.shape_cast %13 : vector<1x1x4x12xf32> to vector<1x4x12xf32>
    %15 = vector.shape_cast %12 : vector<1x4x12xf32> to vector<1x1x4x12xf32>
    tpu.vector_store %arg8[%c0_9, %c0_10, %c0_11, %c0_12], %15 {strides = array<i32>} : memref<1x1x4x12xf32, #tpu.memory_space<vmem>>, vector<1x1x4x12xf32>,
    return
  }
  func.func @transform_0(%arg0: i32, %arg1: i32) -> (i32, i32, i32) {
    %c0_i32 = arith.constant 0 : i32
    %c0_i32_0 = arith.constant 0 : i32
    %c0_i32_1 = arith.constant 0 : i32
    return %arg0, %c0_i32, %c0_i32_0 : i32, i32, i32
  }
  func.func @transform_1(%arg0: i32, %arg1: i32) -> (i32, i32, i32) {
    %c0_i32 = arith.constant 0 : i32
    %c0_i32_0 = arith.constant 0 : i32
    return %arg0, %c0_i32, %arg1 : i32, i32, i32
  }
  func.func @transform_2(%arg0: i32, %arg1: i32) -> (i32, i32) {
    %c0_i32 = arith.constant 0 : i32
    %c0_i32_0 = arith.constant 0 : i32
    %c0_i32_1 = arith.constant 0 : i32
    return %c0_i32, %c0_i32_0 : i32, i32
  }
  func.func @transform_3(%arg0: i32, %arg1: i32) -> (i32, i32, i32) {
    %c0_i32 = arith.constant 0 : i32
    %c0_i32_0 = arith.constant 0 : i32
    %c0_i32_1 = arith.constant 0 : i32
    %c0_i32_2 = arith.constant 0 : i32
    return %c0_i32, %c0_i32_0, %c0_i32_1 : i32, i32, i32
  }
  func.func @transform_4(%arg0: i32, %arg1: i32) -> (i32, i32, i32) {
    %c0_i32 = arith.constant 0 : i32
    %c0_i32_0 = arith.constant 0 : i32
    %c0_i32_1 = arith.constant 0 : i32
    %c0_i32_2 = arith.constant 0 : i32
    return %c0_i32, %c0_i32_0, %c0_i32_1 : i32, i32, i32
  }
  func.func @transform_5(%arg0: i32, %arg1: i32) -> (i32, i32, i32) {
    %c0_i32 = arith.constant 0 : i32
    %c0_i32_0 = arith.constant 0 : i32
    %c0_i32_1 = arith.constant 0 : i32
    return %arg0, %c0_i32, %c0_i32_0 : i32, i32, i32
  }
  func.func @transform_6(%arg0: i32, %arg1: i32) -> (i32, i32, i32, i32) {
    %c0_i32 = arith.constant 0 : i32
    %c0_i32_0 = arith.constant 0 : i32
    %c0_i32_1 = arith.constant 0 : i32
    return %arg1, %arg0, %c0_i32, %c0_i32_0 : i32, i32, i32, i32
  }
}

</mosaic_0001>

<bundles_post_ra>
// kernel: tpu_custom_call.1
= control target key start
LH: loop header
LB: loop body
LE: loop exit
PB: predicated region body
PF: predicated region fallthrough
CT: control target
= control target key end

     0   :  { %s1721_s0 = inlined_call_operand.hbm [shape: f32[2,16,32], index: 0, kind: input, shape index: {}]   ;;  %s1722_s1 = inlined_call_operand.hbm [shape: f32[2,16,48], index: 1, kind: input, shape index: {}]   ;;  %s1723_s2 = inlined_call_operand.vmem [shape: f32[4,32], index: 2, kind: input, shape index: {}]   ;;  %s1724_s3 = inlined_call_operand.vmem [shape: f32[1,4,1], index: 3, kind: input, shape index: {}]   ;;  %s1725_s4 = inlined_call_operand.<no memory space> [shape: f32[1,1,1], index: 4, kind: input, shape index: {}]   ;;  %s1726_s5 = inlined_call_operand.hbm [shape: f32[2,4,32], index: 5, kind: output, shape index: {0}]   ;;  %s1727_s6 = inlined_call_operand.hbm [shape: f32[1,2,4,12], index: 6, kind: output, shape index: {1}]  }
   0x1   :  { %1731 = sst [smem:[#allocation16_spill]] %s1721_s0 }
   0x2   :  { %14 = vsyncpa [#allocation5], 0 }
   0x3   :  { %16 = vsyncpa [#allocation5 + $0x1], 0 }
   0x4   :  { %17 = vsyncpa [#allocation8], 0 }
   0x5   :  { %19 = vsyncpa [#allocation8 + $0x1], 0 }
   0x6   :  { %20 = vsyncpa [#allocation6], 0 }
   0x7   :  { %22 = vsyncpa [#allocation6 + $0x1], 0 }
   0x8   :  { %23 = vsyncpa [#allocation11], 0 }
   0x9   :  { %25 = vsyncpa [#allocation11 + $0x1], 0  ;;  %s1419_s21 = smov 0   ;;  %s1421_s22 = smov 0  }
   0xa   :  { %s1423_s23 = smov 0   ;;  %s1425_s4 = smov 0  }
   0xb   :  { %s1427_s24 = smov 0   ;;  %s1429_s25 = smov 0  }
   0xc LB: > { %s1008_s26 = sadd.s32 4294967295, %s1368_s25   ;;  %s1009_s27 = sadd.s32 4294967294, %s1368_s25   ;;  %s1368_s25 = sphi %s1429_s25, %s31_s25   ;;  %s1364_s24 = sphi %s1427_s24, %s1749_s24   ;;  %s1360_s4 = sphi %s1425_s4, %s1748_s4   ;;  %s1356_s23 = sphi %s1423_s23, %s1747_s23   ;;  %s1352_s22 = sphi %s1421_s22, %s1746_s22   ;;  %s1348_s21 = sphi %s1419_s21, %s1745_s21  }
   0xd   : > { %s43_s28 = sadd.s32 1, %s1364_s24  ;;  %s50_s29 = sadd.s32 1, %s1356_s23 }
   0xe   : > { %p45_p0 = scmp.ge.s32.totalorder %s43_s28, 2  ;;  %p57_p1 = scmp.ne.s32.totalorder %s1356_s23, %s1352_s22 }
   0xf   : > { %p58_p2 = scmp.eq.s32.totalorder %s1368_s25, 0  ;;  %p63_p3 = scmp.ne.s32.totalorder %s1352_s22, %s1348_s21 }
  0x10   : > { %s1751_s28 = smov (%p45_p0, %s43_s28), 0  ;;  %p64_p5 = scmp.eq.s32.totalorder %s1008_s26, 0 }
  0x11   : > { %p1460_p4 = por %p58_p2, %p57_p1  ;;  %s47_s7 = ssub.s32 %s1364_s24, %s1751_s28 }
  0x12   : > { %p178_p6 = scmp.eq.s32.totalorder %s1008_s26, 1  ;;  %p48_p7 = scmp.eq.s32.totalorder %s47_s7, 0 }
  0x13   : > { %p1466_p8 = por %p64_p5, %p63_p3  ;;  %p184_p10 = scmp.eq.s32.totalorder %s1009_s27, 1 }
  0x14   : > { %p1470_p9 = por %p178_p6, %p57_p1  ;;  %p1125_p13 = scmp.lt.s32.totalorder %s1368_s25, 2 }
  0x15   : > { %s1733_s8 = scalar_select %p1466_p8, 1, 0 }
  0x16   : > { %s1734_s9 = scalar_select %p1470_p9, 1, 0 }
  0x17   : > { %s1475_s10 = scalar_select %p48_p7, %s1356_s23, %s50_s29  }
  0x18   : > { %p1477_p11 = por %p184_p10, %p63_p3  ;;  %s1484_s12 = sand.u32 1, %s1356_s23  }
  0x19   : > { %s1012_s13 = sshll.u32 %s1484_s12, 4  ;;  %s1040_s14 = sshll.u32 %s1364_s24, 8 }
  0x1a   : > { %s1735_s11 = scalar_select %p1477_p11, 1, 0 }
  0x1b   : > { %s1736_s0 = sld [smem:[#allocation16_spill]]  ;;  %s245_s18 = scalar_lea.vmem [#allocation4], %s1012_s13 }
  0x1c   : > { %s252_s19 = sshll.u32 %s245_s18, 4  ;;  %p1501_p0 = pnand %p1125_p13, %p1460_p4  ;;  %s1497_s19 = int_to_ptr.vmem [resolvable:$true] %s252_s19 }
  0x1d   : > { %s242_s26 = scalar_lea.sflag [#allocation5], %s1484_s12 }
  0x1e   : > { %p1192_p3 = pneg %p1501_p0 }
  0x21   : > { %s1493_s17 = scalar_lea.hbm %s1736_s0, %s1040_s14  ;;  %s1195_s30 = scalar_lea.hbm %s1736_s0, 512 }
  0x22   : > { %s1190_s27 = scalar_lea.hbm %s1493_s17, 256  ;;  %p1196_p4 = scmp.lt.u32.totalorder %s1493_s17, %s1736_s0 }
  0x23   : > { %p1191_p2 = scmp.ne.s32.totalorder %s1493_s17, %s1190_s27  ;;  %p1197_p7 = scmp.lt.u32.totalorder %s1195_s30, %s1190_s27 }
  0x24   : > { %p1199_p13 = scmp.lt.u32.totalorder %s1190_s27, %s1493_s17 }
  0x25   : > { %p1193_p5 = pnand %p1192_p3, %p1191_p2  ;;  %p1198_p10 = por %p1197_p7, %p1196_p4 }
  0x27   : > { %p1194_p6 = pneg %p1193_p5  ;;  %p1200_p12 = por %p1199_p13, %p1198_p10 }
  0x29   : > { %p1201_p1 = pnand %p1200_p12, %p1194_p6 }
  0x2b   : > { %1204 = shalt.err (!%p1201_p1)
}
  0x2c   : > { %s1205_s18 = scalar_lea.vmem %s1497_s19, 256  ;;  %s1370_s29 = smov [#allocation4]  }
  0x2d   : > { %p1206_p2 = scmp.ne.s32.totalorder %s1497_s19, %s1205_s18  ;;  %s1210_s7 = sshll.u32 %s1370_s29, 4  ;;  %s1211_s7 = int_to_ptr.vmem [resolvable:$false] %s1210_s7 }
  0x2e   : > { %s1212_s15 = scalar_lea.vmem %s1211_s7, 512  ;;  %p1213_p9 = scmp.lt.s32.totalorder %s1497_s19, %s1211_s7 }
  0x2f   : > { %p1208_p5 = pnand %p1206_p2, %p1192_p3  ;;  %p1214_p4 = scmp.lt.s32.totalorder %s1212_s15, %s1205_s18 }
  0x31   : > { %p1209_p11 = pneg %p1208_p5  ;;  %p1215_p7 = por %p1214_p4, %p1213_p9 }
  0x33   : > { %p1216_p10 = pnand %p1215_p7, %p1209_p11 }
  0x35   : > { %1219 = shalt.err (!%p1216_p10)
}
  0x36   : > { %s1729_s27 = smov 128   ;;  %s1372_s30 = smov 8  }
  0x37   : > { %1114 = dma.hbm_to_vmem [thread:$0]  (!%p1501_p0), %s1493_s17, 256, %s1497_s19, %s242_s26, %s1729_s27, %s1729_s27, %s1372_s30  }
  0x38   : > { %p282_p9 = scmp.lt.s32.totalorder %s1368_s25, 3  ;;  %s1543_s29 = scalar_lea.hbm %s1722_s1, %s1040_s14 }
  0x39   : > { %p1738_p11 = scmp.ge.s32.totalorder %s1368_s25, 1  ;;  %s266_s15 = scalar_lea.vmem [#allocation7], %s1012_s13 }
  0x3a   : > { %s274_s0 = sshll.u32 %s266_s15, 4  ;;  %s263_s17 = scalar_lea.sflag [#allocation8], %s1484_s12  ;;  %s1553_s0 = int_to_ptr.vmem [resolvable:$true] %s274_s0 }
  0x3b   : > { %p1547_p12 = pnand %p1738_p11, %p282_p9  ;;  %s1220_s19 = scalar_lea.hbm %s1543_s29, 256 }
  0x3c   : > { %p1221_p1 = scmp.ne.s32.totalorder %s1543_s29, %s1220_s19  ;;  %s1225_s16 = scalar_lea.hbm %s1722_s1, 512 }
  0x3d   : > { %p1226_p2 = scmp.lt.u32.totalorder %s1543_s29, %s1722_s1  ;;  %p1227_p5 = scmp.lt.u32.totalorder %s1225_s16, %s1220_s19 }
  0x3e   : > { %p1223_p6 = pnand %p1221_p1, %p1192_p3  ;;  %p1229_p7 = scmp.lt.u32.totalorder %s1220_s19, %s1543_s29 }
  0x3f   : > { %p1228_p4 = por %p1227_p5, %p1226_p2 }
  0x40   : > { %p1224_p13 = pneg %p1223_p6 }
  0x41   : > { %p1230_p10 = por %p1229_p7, %p1228_p4 }
  0x43   : > { %p1231_p9 = pnand %p1230_p10, %p1224_p13 }
  0x45   : > { %1234 = shalt.err (!%p1231_p9)
}
  0x46   : > { %s1235_s13 = scalar_lea.vmem %s1553_s0, 256  ;;  %s1373_s15 = smov [#allocation7]  }
  0x47   : > { %p1236_p11 = scmp.ne.s32.totalorder %s1553_s0, %s1235_s13  ;;  %s1240_s14 = sshll.u32 %s1373_s15, 4  ;;  %s1241_s14 = int_to_ptr.vmem [resolvable:$false] %s1240_s14 }
  0x48   : > { %s1242_s27 = scalar_lea.vmem %s1241_s14, 512  ;;  %p1243_p8 = scmp.lt.s32.totalorder %s1553_s0, %s1241_s14 }
  0x49   : > { %p1238_p1 = pnand %p1236_p11, %p1192_p3  ;;  %p1244_p2 = scmp.lt.s32.totalorder %s1242_s27, %s1235_s13 }
  0x4b   : > { %p1239_p6 = pneg %p1238_p1  ;;  %p1245_p5 = por %p1244_p2, %p1243_p8 }
  0x4d   : > { %p1246_p4 = pnand %p1245_p5, %p1239_p6 }
  0x4f   : > { %1249 = shalt.err (!%p1246_p4)
}
  0x50   : > { %s1740_s19 = smov 128   ;;  %286 = sbr.rel (%p1547_p12) target bundleno = 1316 (0x524), region = 40 }
  0x51   : > { %1117 = dma.hbm_to_vmem [thread:$0]  (!%p1501_p0), %s1543_s29, 256, %s1553_s0, %s263_s17, %s1740_s19, %s1740_s19, %s1372_s30  }
  0x52   : > { %s1587_s26 = sand.u32 (!%p1547_p12), 1, %s1352_s22   ;;  %p1741_p8 = scmp.ne.s32.totalorder (!%p1547_p12), %s1733_s8, 0 }
  0x53   : > { %s1019_s16 = sshll.u32 (!%p1547_p12), %s1587_s26, 4  ;;  %s289_s18 = scalar_lea.sflag (!%p1547_p12), [#allocation5], %s1587_s26 }
  0x54   : > { %s292_s20 = scalar_lea.vmem (!%p1547_p12), [#allocation4], %s1019_s16 }
  0x57   : > { %1331 = dma.done.wait (%p1741_p8), %s289_s18, 256  }
  0x58   : > { %1333 = vsyncadd (%p1741_p8), %s289_s18, 4294967040  ;;  %s298_s0 = scalar_lea.sflag [#allocation8], %s1587_s26  ;;  %s1596_s12 = scalar_lea.vmem [#allocation7], %s1019_s16 }
  0x59   : > { %1335 = dma.done.wait (%p1741_p8), %s298_s0, 256  }
  0x5a   : > { %1337 = vsyncadd (%p1741_p8), %s298_s0, 4294967040  ;;  %v1374_v0 = vmov 0.0|0.0   ;;  %vm1375_vm0 = vmmov 0   ;;  %v1376_v1 = vmov 0.0   ;;  %v1377_v2 = vmov 0   ;;  %v344_v3 = vld [vmem:[%s292_s20] sm:$0xff] }
  0x5b   : > { %1093 = vmatprep.subr.bf16.mxu0 %v1374_v0  ;;  %1061 = vmatprep.mubr.msk.f32.mxu0 %vm1375_vm0, %v1376_v1  ;;  %vm353_vm1 = vcmask 261120   ;;  %v345_v4 = vld [vmem:[%s292_s20 + $0x8] sm:$0xff]  ;;  %vm433_vm3 = vcmask 125952   ;;  %v526_v22 = vld [vmem:[%s1596_s12] sm:$0xff]  ;;  %vm449_vm4 = vcmask 130048   ;;  %s1021_s17 = sshll.u32 %s1587_s26, 2 }
  0x5c   : > { %1185 = vset.pattern.permute.xlu0 %v1377_v2  ;;  %1097 = vmatprep.subr.bf16.mxu1 %v1374_v0  ;;  %vm1095_vm2 = vmpackc.low %vm353_vm1, %vm353_vm1  ;;  %v1094_v5 = vpack.c.bf16 %v345_v4, %v344_v3  ;;  %v347_v6 = vld [vmem:[%s1724_s3] sm:$0xf]  ;;  %vm523_vm5 = vcmask 257024   ;;  %s332_s13 = scalar_lea.vmem [#allocation9], %s1021_s17  ;;  %s1378_s15 = smov 112  }
  0x5d   : > { %1068 = vmatprep.mubr.msk.f32.mxu1 %vm1375_vm0, %v1376_v1  ;;  %350 = vperm.xlu0 %1185, %v347_v6   ;;  %v346_v7 = vld [vmem:[%s1723_s2] sm:$0xf]  ;;  %s1379_s14 = smov 96   ;;  %s1036_s27 = sshll.u32 %s1360_s4, 6 }
  0x5e   : > { %1096 = vmatpush3.bf16.xpose.msk.msra.mxu0 %vm1095_vm2, %v1094_v5  ;;  %1099 = vmatpush3.bf16.msra.mxu1 %v1094_v5  ;;  %v527_v23 = vld [vmem:[%s1596_s12 + $0x8] sm:$0xff]  ;;  %s1645_s18 = scalar_lea.hbm %s1726_s5, %s1036_s27  ;;  %s856_s20 = sshll.u32 %s332_s13, 4  ;;  %s857_s20 = int_to_ptr.vmem [resolvable:$true] %s856_s20 }
  0x5f   : > { %1100 = vmatprep.subr.bf16.mxu1 %v1374_v0  ;;  %1078 = vmatprep.subr.mxu0 %v1376_v1  ;;  %v1101_v25 = vpack.c.bf16 %v527_v23, %v526_v22  ;;  %s838_s0 = scalar_lea.sflag [#allocation6], %s1587_s26  ;;  %s1250_s12 = scalar_lea.vmem %s857_s20, 64 }
  0x60   : > { %p1251_p0 = scmp.ne.s32.totalorder %s857_s20, %s1250_s12  ;;  %p1742_p3 = scmp.ne.s32.totalorder %s1734_s9, 0 }
  0x61   : > { %s1380_s8 = smov [#allocation9]  }
  0x62   : > { %p1252_p12 = pnand %p1251_p0, %p1742_p3  ;;  %s1254_s30 = sshll.u32 %s1380_s8, 4  ;;  %s1255_s30 = int_to_ptr.vmem [resolvable:$false] %s1254_s30 }
  0x63   : > { %s1256_s29 = scalar_lea.vmem %s1255_s30, 128  ;;  %p1257_p7 = scmp.lt.s32.totalorder %s857_s20, %s1255_s30 }
  0x64   : > { %p1253_p13 = pneg %p1252_p12  ;;  %p1258_p10 = scmp.lt.s32.totalorder %s1256_s29, %s1250_s12 }
  0x65   : > { %1062 = vmatmul.mubr.msk.f32.vlgmr.msra.gmra.mrb[0].mxu0 %vm353_vm1, %v346_v7 }
  0x66   : > { %1080 = vmatprep.mubr.msk.f32.mxu0 %vm1375_vm0, %v1376_v1  ;;  %p1259_p9 = por %p1258_p10, %p1257_p7 }
  0x68   : > { %p1260_p11 = pnand %p1259_p9, %p1253_p13 }
  0xdc   : > { %v351_v8 = vpop.permute.xlu0 %350 }
 0x138   : > { %v429_v9 = vpop.f32.mrb[0].mxu0 }
 0x139   : > { %v430_v10 = vadd.f32 %v429_v9, %v351_v8  ;;  %v1063_v11 = vpop.f32.mrb[1].mxu0 }
 0x13b   : > { %v434_v12 = vsel %vm433_vm3, %v430_v10, -inf }
 0x13c   : > { %435 = vmax.xlane.f32.xlu0 %v434_v12 }
 0x1c9   : > { %v436_v13 = vpop.xlane.xlu0 %435 }
 0x1ca   : > { %v437_v14 = vsub.f32 %v430_v10, %v436_v13 }
 0x1cc   : > { %v438_v15 = vmul.f32 1.442695, %v437_v14 }
 0x1ce   : > { %1186 = vpow2.f32 %v438_v15 }
 0x1d8   : > { %v1187_v16 = vpop.eup %1186 }
 0x1d9   : > { %v440_v17 = vsel %vm433_vm3, %v1187_v16, 0.0 }
 0x1da   : > { %441 = vadd.xlane.f32.xlu1 %v440_v17 }
 0x267   : > { %v442_v18 = vpop.xlane.xlu1 %441 }
 0x268   : > { %1188 = vrcp.f32 %v442_v18 }
 0x272   : > { %v1189_v19 = vpop.eup %1188 }
 0x273   : > { %v444_v20 = vmul.f32 %v1189_v19, %v442_v18 }
 0x275   : > { %v445_v21 = vsub.f32 2.0, %v444_v20 }
 0x277   : > { %v446_v24 = vmul.f32 %v1189_v19, %v445_v21 }
 0x279   : > { %v447_v26 = vmul.f32 %v1187_v16, %v446_v24 }
 0x27b   : > { %448 = vst.msk [vmem:[#allocation2] sm:$0xf] %vm433_vm3, %v447_v26  ;;  %1069 = vmatmul.mubr.msk.f32.vlgmr.msra.gmra.mrb[0].mxu1 %vm449_vm4, %v447_v26 }
 0x27c   : > { %1102 = vmatpush3.bf16.msra.mxu1 %v1101_v25  ;;  %1075 = vmatprep.mubr.msk.f32.mxu1 %vm1375_vm0, %v1376_v1 }
 0x27d   : > { %1083 = vmatprep.subr.mxu1 %v1376_v1 }
 0x282   : > { %v525_v27 = vld [vmem:[#allocation2] sm:$0xf] }
 0x283   : > { %1076 = vmatmul.mubr.msk.f32.vlgmr.msra.gmra.mrb[2].mxu1 %vm449_vm4, %v525_v27  ;;  %1079 = vmatpush3.xpose.msk.msra.mxu0 %vm449_vm4, %v525_v27 }
 0x284   : > { %1088 = vmatprep.subr.mxu0 %v1376_v1  ;;  %1085 = vmatprep.mubr.msk.f32.mxu1 %vm1375_vm0, %v1376_v1 }
 0x285   : > { %1084 = vmatpush3.xpose.msk.msra.mxu1 %vm449_vm4, %v525_v27 }
 0x34e   : > { %v519_v28 = vpop.f32.mrb[0].mxu1 }
 0x34f   : > { %524 = vst.msk [vmem:[%s332_s13] sm:$0xf] %vm523_vm5, %v519_v28  ;;  %v1070_v29 = vpop.f32.mrb[1].mxu1 }
 0x356   : > { %v598_v30 = vpop.f32.mrb[2].mxu1 }
 0x357   : > { %675 = vrot.lane.b32.xlu1 %v598_v30, %s1378_s15  ;;  %v1077_v31 = vpop.f32.mrb[3].mxu1  ;;  %1081 = vmatmul.mubr.msk.f32.vlgmr.msra.gmra.mrb[2].mxu0 %vm449_vm4, %v598_v30 }
 0x358   : > { %1089 = vmatpush3.xpose.msk.msra.mxu0 %vm449_vm4, %v525_v27  ;;  %1090 = vmatprep.mubr.msk.f32.mxu0 %vm1375_vm0, %v1376_v1 }
 0x35b   : > { %749 = vrot.lane.b32.xlu1 %v598_v30, %s1379_s14 }
 0x3c9   : > { %v676_v32 = vpop.permute.xlu1 %675 }
 0x3ca   : > { %1086 = vmatmul.mubr.msk.f32.vlgmr.msra.gmra.mrb[4].mxu1 %vm449_vm4, %v676_v32 }
 0x3cd   : > { %v750_v33 = vpop.permute.xlu1 %749 }
 0x3ce   : > { %1091 = vmatmul.mubr.msk.f32.vlgmr.msra.gmra.mrb[4].mxu0 %vm449_vm4, %v750_v33 }
 0x42a   : > { %v671_v34 = vpop.f32.mrb[2].mxu0 }
 0x42b   : > { %v1082_v35 = vpop.f32.mrb[3].mxu0 }
 0x42c   : > { %1263 = shalt.err (!%p1260_p11)
}
 0x42d   : > { %s1264_s7 = scalar_lea.hbm %s1645_s18, 64  ;;  %s1268_s14 = scalar_lea.hbm %s1726_s5, 128 }
 0x42e   : > { %p1265_p1 = scmp.ne.s32.totalorder %s1645_s18, %s1264_s7  ;;  %p1269_p5 = scmp.lt.u32.totalorder %s1645_s18, %s1726_s5 }
 0x42f   : > { %p1270_p4 = scmp.lt.u32.totalorder %s1268_s14, %s1264_s7  ;;  %p1272_p0 = scmp.lt.u32.totalorder %s1264_s7, %s1645_s18 }
 0x430   : > { %p1266_p6 = pnand %p1265_p1, %p1742_p3 }
 0x431   : > { %p1271_p8 = por %p1270_p4, %p1269_p5 }
 0x432   : > { %p1267_p2 = pneg %p1266_p6 }
 0x433   : > { %p1273_p12 = por %p1272_p0, %p1271_p8 }
 0x435   : > { %p1274_p13 = pnand %p1273_p12, %p1267_p2 }
 0x437   : > { %1277 = shalt.err (!%p1274_p13)
}
 0x438   : > { %1107 = dma.vmem_to_hbm [thread:$0]  (%p1742_p3), %s857_s20, 64, %s1645_s18, %s838_s0   ;;  %vm831_vm6 = vcmask 31744   ;;  %vm833_vm7 = vcmask 64512   ;;  %vm835_vm8 = vcmask 93184  }
 0x439   : > { %s1381_s12 = smov 4   ;;  %s1382_s8 = smov 8  }
 0x43a   : > { %s339_s30 = scalar_lea.vmem [#allocation10], %s1021_s17  ;;  %s1672_s0 = scalar_lea.hbm %s1727_s6, %s1036_s27 }
 0x43b   : > { %s871_s29 = sshll.u32 %s339_s30, 4  ;;  %s843_s7 = scalar_lea.sflag [#allocation11], %s1587_s26  ;;  %s1674_s29 = int_to_ptr.vmem [resolvable:$true] %s871_s29 }
 0x43c   : > { %s1278_s17 = scalar_lea.vmem %s1674_s29, 64  ;;  %s1383_s13 = smov [#allocation10]  }
 0x43d   : > { %p1279_p7 = scmp.ne.s32.totalorder %s1674_s29, %s1278_s17  ;;  %s1282_s4 = sshll.u32 %s1383_s13, 4  ;;  %s1283_s4 = int_to_ptr.vmem [resolvable:$false] %s1282_s4 }
 0x43e   : > { %s1284_s15 = scalar_lea.vmem %s1283_s4, 128  ;;  %p1285_p11 = scmp.lt.s32.totalorder %s1674_s29, %s1283_s4 }
 0x43f   : > { %p1280_p10 = pnand %p1279_p7, %p1742_p3  ;;  %p1286_p1 = scmp.lt.s32.totalorder %s1284_s15, %s1278_s17 }
 0x441   : > { %p1281_p9 = pneg %p1280_p10  ;;  %p1287_p6 = por %p1286_p1, %p1285_p11 }
 0x443   : > { %p1288_p2 = pnand %p1287_p6, %p1281_p9 }
 0x49d   : > { %v745_v36 = vpop.f32.mrb[4].mxu1 }
 0x49e   : > { %824 = vrot.lane.b32.xlu1 %v745_v36, %s1381_s12  ;;  %v1087_v37 = vpop.f32.mrb[5].mxu1 }
 0x4a1   : > { %v819_v38 = vpop.f32.mrb[4].mxu0 }
 0x4a2   : > { %828 = vrot.lane.b32.xlu1 %v819_v38, %s1382_s8  ;;  %v1092_v39 = vpop.f32.mrb[5].mxu0 }
 0x510   : > { %v825_v40 = vpop.permute.xlu1 %824 }
 0x511   : > { %v832_v41 = vsel %vm831_vm6, %v671_v34, %v825_v40 }
 0x514   : > { %v829_v42 = vpop.permute.xlu1 %828 }
 0x515   : > { %v834_v43 = vsel %vm833_vm7, %v832_v41, %v829_v42 }
 0x516   : > { %836 = vst.msk [vmem:[%s339_s30] sm:$0xf] %vm835_vm8, %v834_v43 }
 0x517   : > { %1291 = shalt.err (!%p1288_p2)
}
 0x518   : > { %s1292_s26 = scalar_lea.hbm %s1672_s0, 64  ;;  %s1296_s19 = scalar_lea.hbm %s1727_s6, 128 }
 0x519   : > { %p1293_p5 = scmp.ne.s32.totalorder %s1672_s0, %s1292_s26  ;;  %p1297_p0 = scmp.lt.u32.totalorder %s1672_s0, %s1727_s6 }
 0x51a   : > { %p1298_p12 = scmp.lt.u32.totalorder %s1296_s19, %s1292_s26  ;;  %p1300_p7 = scmp.lt.u32.totalorder %s1292_s26, %s1672_s0 }
 0x51b   : > { %p1294_p4 = pnand %p1293_p5, %p1742_p3 }
 0x51c   : > { %p1299_p13 = por %p1298_p12, %p1297_p0 }
 0x51d   : > { %p1295_p8 = pneg %p1294_p4 }
 0x51e   : > { %p1301_p10 = por %p1300_p7, %p1299_p13 }
 0x520   : > { %p1302_p9 = pnand %p1301_p10, %p1295_p8 }
 0x522   : > { %1305 = shalt.err (!%p1302_p9)
}
 0x523   : > { %1108 = dma.vmem_to_hbm [thread:$0]  (%p1742_p3), %s1674_s29, 64, %s1672_s0, %s843_s7  }
 0x524 PF: > { %s883_s8 = sand.u32 1, %s1348_s21   ;;  %p1743_p11 = scmp.ne.s32.totalorder %s1735_s11, 0 }
 0x525   : > { %p1744_p1 = scmp.ge.s32.totalorder %s1368_s25, 2  ;;  %s884_s30 = scalar_lea.sflag [#allocation6], %s883_s8 }
 0x527   : > { %p1119_p6 = pnand %p1744_p1, %p1743_p11 }
 0x529   : > { %1339 = dma.done.wait (!%p1119_p6), %s884_s30, 64  }
 0x52a   : > { %1341 = vsyncadd (!%p1119_p6), %s884_s30, 4294967232  ;;  %s893_s18 = scalar_lea.sflag [#allocation11], %s883_s8 }
 0x52b   : > { %1343 = dma.done.wait (!%p1119_p6), %s893_s18, 64  }
 0x52c   : > { %1345 = vsyncadd (!%p1119_p6), %s893_s18, 4294967232  ;;  %s31_s25 = sadd.s32 1, %s1368_s25   ;;  %s1745_s21 = smov %s1352_s22 }
 0x52d   : > { %p28_p2 = scmp.ge.s32.totalorder %s31_s25, 4   ;;  %s1746_s22 = smov %s1356_s23 }
 0x52e   : > { %s1747_s23 = smov %s1475_s10  ;;  %s1748_s4 = smov %s1364_s24 }
 0x52f   : > { %s1749_s24 = smov %s1751_s28  ;;  %30 = sbr.rel (!%p28_p2) target bundleno = 12 (0xc), region = 119 }
 0x536   :  { %898 = vsyncpa [#allocation5], 1 }
 0x537   :  { %900 = vsyncpa [#allocation5 + $0x1], 1 }
 0x538   :  { %901 = vsyncpa [#allocation8], 1 }
 0x539   :  { %903 = vsyncpa [#allocation8 + $0x1], 1 }
 0x53a   :  { %904 = vsyncpa [#allocation6], 1 }
 0x53b   :  { %906 = vsyncpa [#allocation6 + $0x1], 1 }
 0x53c   :  { %907 = vsyncpa [#allocation11], 1 }
 0x53d   :  { %909 = vsyncpa [#allocation11 + $0x1], 1 }

</bundles_post_ra>
